<compile_context>
chip_gen: v6e
topology: v6e:2x2x1
jax: 0.10.0
libtpu: 0.0.40
codegen_flags: <defaults>
</compile_context>

<pallas_src>
import functools
import math

import jax
import jax.numpy as jnp
from jax import lax
from jax.experimental import pallas as pl
from jax.experimental.pallas import tpu as pltpu

_GELU_C = math.sqrt(2.0 / math.pi)


def _ffn_kernel(x_ref, w1_ref, b1_ref, w2_ref, b2_ref, out_ref, h_sc, acc_sc,
                *, eps, tile_f, resident):
    """One (tile_r, d_model) row tile x one (tile_f,) slab of d_ff."""
    f = pl.program_id(1)

    # --- init phase: layer-norm the row tile once, zero the accumulator -----
    @pl.when(f == 0)
    def _():
        x = x_ref[...].astype(jnp.float32)
        mu = jnp.mean(x, axis=-1, keepdims=True)
        xc = x - mu
        var = jnp.mean(xc * xc, axis=-1, keepdims=True)
        # gamma/beta are folded into W1/b1 offline -> plain normalization here.
        # Single cast to the matmul operand dtype (bf16 weights => bf16 h).
        h_sc[...] = (xc * lax.rsqrt(var + eps)).astype(h_sc.dtype)
        acc_sc[...] = jnp.zeros_like(acc_sc)

    if resident:
        # Weights are VMEM-resident full-size; take this d_ff slab by a
        # sublane-dim dynamic slice (offset is a multiple of tile_f).
        off = pl.multiple_of(f * tile_f, 8)
        w1 = w1_ref[pl.ds(off, tile_f), :]     # (tile_f, D) slab of W1 (gamma folded)
        w2 = w2_ref[pl.ds(off, tile_f), :]     # (tile_f, D) slab of W2^T
    else:
        w1 = w1_ref[...]                       # streamed (tile_f, D) slab
        w2 = w2_ref[...]

    # --- first linear: h @ W1_slab^T (operands in native dtype, f32 acc) ----
    inter = lax.dot_general(h_sc[...], w1, (((1,), (1,)), ((), ())),
                            preferred_element_type=jnp.float32)
    inter = inter + b1_ref[...].astype(jnp.float32)
    # tanh-approx gelu (as in the PyTorch spec), in f32.
    act = 0.5 * inter * (1.0 + jnp.tanh(
        _GELU_C * (inter + 0.044715 * inter * inter * inter)))

    # --- second linear: accumulate this d_ff slab in the f32 accumulator ----
    acc_sc[...] += jnp.dot(act.astype(w2.dtype), w2,
                           preferred_element_type=jnp.float32)

    # --- finalize: bias + residual, single lane-dense store of the tile -----
    @pl.when(f == pl.num_programs(1) - 1)
    def _():
        out_ref[...] = (acc_sc[...]
                        + b2_ref[...].astype(jnp.float32)
                        + x_ref[...].astype(jnp.float32)).astype(out_ref.dtype)


def _vmem_capacity_bytes():
    """Physical VMEM of the attached TPU (fallback: v7x's 64 MiB)."""
    try:
        info = pltpu.get_tpu_info()
        for attr in ("vmem_capacity_bytes", "vmem_bytes", "vmem_size_bytes"):
            v = getattr(info, attr, None)
            if v:
                return int(v)
    except Exception:
        pass
    return 64 * 1024 * 1024


def _largest_divisor_tile(total, cap, align):
    """Largest multiple of `align` that divides `total` and is <= cap, or None."""
    cap = min(cap, total)
    t = cap - (cap % align)
    while t >= align:
        if total % t == 0:
            return t
        t -= align
    return None


def _plan(rows, D, d_ff, x_dtype, w_dtype, out_dtype, tile_r, tile_f,
          weights_resident):
    """Generation-aware tile sizes, weight residency and VMEM limit."""
    vmem_cap = _vmem_capacity_bytes()
    budget = int(vmem_cap * 0.75)          # headroom for compiler scratch

    x_it = jnp.dtype(x_dtype).itemsize
    w_it = jnp.dtype(w_dtype).itemsize
    o_it = jnp.dtype(out_dtype).itemsize
    align_r = 16 if min(x_it, w_it, o_it) < 4 else 8   # bf16 sublane packing

    # d_ff compute tile: multiple of 128 dividing d_ff, else the whole d_ff.
    if tile_f is None:
        tile_f = _largest_divisor_tile(d_ff, min(d_ff, 512), 128) or d_ff

    # Resident weights = W1 (gamma-folded) + W2^T, both (d_ff, D).  Pallas may
    # still allocate double buffers for the constant blocks, so require 2x to
    # fit comfortably inside half the budget.
    weight_bytes = 2 * d_ff * D * w_it
    if weights_resident is None:
        weights_resident = 2 * weight_bytes <= budget // 2

    def vmem_need(tr):
        blocks = 2 * tr * D * (x_it + o_it)            # double-buffered x / out
        scratch = tr * D * (w_it + 4)                  # h_sc + f32 acc_sc
        if weights_resident:
            wts = 2 * weight_bytes
        else:                                          # two streamed slabs (x2 buf)
            wts = 2 * (2 * tile_f * D * w_it)
        bias = 2 * (tile_f + D) * 4
        return blocks + scratch + wts + bias + (1 << 20)

    if tile_r is None:
        target = 1024 if budget >= 72 * (1 << 20) else 512
        tr = target
        while tr > align_r and vmem_need(tr) > budget:
            tr //= 2
        tr = max(align_r, tr - tr % align_r)
        rows_pad = ((rows + align_r - 1) // align_r) * align_r
        tr = min(tr, rows_pad)
        # keep >= 2 row tiles so the "parallel" axis shards across TensorCores
        if rows_pad // tr < 2 and rows_pad >= 2 * align_r:
            half = rows_pad // 2
            tr = max(align_r, half - half % align_r)
        # prefer a row tile that divides rows exactly (skips the pad copy)
        tile_r = _largest_divisor_tile(rows, tr, align_r) or tr

    vmem_limit = max(min(budget, vmem_need(tile_r) + (8 << 20)), 32 << 20)
    vmem_limit = min(vmem_limit, int(vmem_cap * 0.85))
    return tile_r, tile_f, weights_resident, vmem_limit


def prepare_params(ln_weight, ln_bias, w1, b1, w2, b2):
    """One-time parameter prep (setup time, not per call).

    * Folds LayerNorm gamma/beta into the first linear:
        (n*g + b) @ W1^T + b1  ==  n @ (W1*g)^T + (b1 + W1 @ b)
      where n is the plain normalization, so the kernel only normalizes.
    * Stores W2 pre-transposed (d_ff, d_model) so no per-call transpose copy.
    """
    f32 = jnp.float32
    w1_f = jnp.asarray(w1).astype(f32)
    w1_eff = (w1_f * jnp.asarray(ln_weight).astype(f32)[None, :]).astype(w1.dtype)
    b1_eff = (jnp.asarray(b1).astype(f32)
              + w1_f @ jnp.asarray(ln_bias).astype(f32)).reshape(1, -1)
    return dict(
        w1=w1_eff,                         # (d_ff, d_model), gamma folded in
        b1=b1_eff,                         # (1, d_ff) f32, beta folded in
        w2_t=jnp.asarray(w2).T,            # (d_ff, d_model)
        b2=jnp.asarray(b2).reshape(1, -1), # (1, d_model)
    )


def positionwise_feed_forward(x, params, *, eps=1e-6, tile_r=None, tile_f=None,
                              weights_resident=None):
    """Eval-mode forward of PositionwiseFeedForward.

    x: (B, S, d_model); params: output of prepare_params().
    """
    w1, b1, w2_t, b2 = params["w1"], params["b1"], params["w2_t"], params["b2"]
    B, S, D = x.shape
    d_ff = w1.shape[0]
    rows = B * S

    # Lane-dense 2-D view: (rows, d_model), d_model on the lane axis.
    x2 = x.reshape(rows, D)

    tile_r, tile_f, weights_resident, vmem_limit = _plan(
        rows, D, d_ff, x.dtype, w1.dtype, x.dtype, tile_r, tile_f,
        weights_resident)
    assert d_ff % tile_f == 0, (d_ff, tile_f)

    pad_r = (-rows) % tile_r
    if pad_r:
        x2 = jnp.pad(x2, ((0, pad_r), (0, 0)))
    R = rows + pad_r

    if weights_resident:
        # Full-size blocks with a constant index_map -> DMA'd once, then
        # VMEM-resident for the entire grid; the kernel slices them with pl.ds.
        w1_spec = pl.BlockSpec((d_ff, D), lambda r, f: (0, 0))
        w2_spec = pl.BlockSpec((d_ff, D), lambda r, f: (0, 0))
    else:
        # Streamed (tile_f, d_model) slabs (lane-dense last dim).
        # NOTE: if DMA-bound (v5e/f32), pipeline_mode=pl.Buffered(3) here can
        # hide the weight stream at the cost of ~1.5x slab VMEM.
        w1_spec = pl.BlockSpec((tile_f, D), lambda r, f: (f, 0))
        w2_spec = pl.BlockSpec((tile_f, D), lambda r, f: (f, 0))

    kernel = functools.partial(_ffn_kernel, eps=eps, tile_f=tile_f,
                               resident=weights_resident)

    out = pl.pallas_call(
        kernel,
        out_shape=jax.ShapeDtypeStruct((R, D), x.dtype),
        grid_spec=pltpu.PrefetchScalarGridSpec(
            num_scalar_prefetch=0,
            grid=(R // tile_r, d_ff // tile_f),
            in_specs=[
                pl.BlockSpec((tile_r, D), lambda r, f: (r, 0)),   # x rows
                w1_spec,                                          # W1 (gamma folded)
                pl.BlockSpec((1, tile_f), lambda r, f: (0, f)),   # b1 slab (tiny)
                w2_spec,                                          # W2^T
                pl.BlockSpec((1, D), lambda r, f: (0, 0)),        # b2
            ],
            out_specs=pl.BlockSpec((tile_r, D), lambda r, f: (r, 0)),
            scratch_shapes=[
                pltpu.VMEM((tile_r, D), w1.dtype),     # cached LayerNorm(x) tile
                pltpu.VMEM((tile_r, D), jnp.float32),  # f32 output accumulator
            ],
        ),
        compiler_params=pltpu.CompilerParams(
            dimension_semantics=("parallel", "arbitrary"),
            vmem_limit_bytes=int(vmem_limit)),
    )(x2, w1, b1, w2_t, b2)

    if pad_r:
        out = out[:rows]
    return out.reshape(B, S, D)


if __name__ == "__main__":
    # Small deterministic example: batch=2, seq=8, d_model=128, d_ff=256.
    B, S, D, DFF = 2, 8, 128, 256
    key = jax.random.PRNGKey(0)
    kx, k1, k2, k3, k4, k5, k6 = jax.random.split(key, 7)

    x = jax.random.normal(kx, (B, S, D), dtype=jnp.float32)
    w1 = jax.random.normal(k1, (DFF, D), dtype=jnp.float32) * 0.05
    b1 = jax.random.normal(k2, (DFF,), dtype=jnp.float32) * 0.05
    w2 = jax.random.normal(k3, (D, DFF), dtype=jnp.float32) * 0.05
    b2 = jax.random.normal(k4, (D,), dtype=jnp.float32) * 0.05
    ln_w = 1.0 + 0.1 * jax.random.normal(k5, (D,), dtype=jnp.float32)
    ln_b = 0.1 * jax.random.normal(k6, (D,), dtype=jnp.float32)

    params = prepare_params(ln_w, ln_b, w1, b1, w2, b2)

    # Pure-JAX reference (eval-mode dropout == identity, un-folded LN).
    mu = jnp.mean(x, axis=-1, keepdims=True)
    var = jnp.mean((x - mu) ** 2, axis=-1, keepdims=True)
    h = (x - mu) / jnp.sqrt(var + 1e-6) * ln_w + ln_b
    inter = h @ w1.T + b1
    act = 0.5 * inter * (1.0 + jnp.tanh(
        math.sqrt(2.0 / math.pi) * (inter + 0.044715 * inter ** 3)))
    ref = act @ w2.T + b2 + x

    # tile_r=8 / tile_f=128 so both grid axes are exercised on the tiny demo.
    # (1) resident-weight path (auto: weights easily fit VMEM).
    out_res = positionwise_feed_forward(x, params, tile_r=8, tile_f=128)
    out_res = jax.block_until_ready(out_res)
    assert out_res.shape == (B, S, D)
    err = float(jnp.max(jnp.abs(out_res - ref)))
    assert jnp.allclose(out_res, ref, atol=1e-2, rtol=1e-2), err

    # (2) streaming-slab fallback path (forced), same numerics.
    out_str = positionwise_feed_forward(x, params, tile_r=8, tile_f=128,
                                        weights_resident=False)
    out_str = jax.block_until_ready(out_str)
    err = float(jnp.max(jnp.abs(out_str - ref)))
    assert jnp.allclose(out_str, ref, atol=1e-2, rtol=1e-2), err

    print("KERNEL_OK")
</pallas_src>

<mosaic_0001>
module attributes {stable_mosaic.version = 11 : i64} {
  func.func @_ffn_kernel(%arg0: i32, %arg1: i32, %arg2: memref<8x128xf32, #tpu.memory_space<vmem>>, %arg3: memref<256x128xf32, #tpu.memory_space<vmem>>, %arg4: memref<1x128xf32, #tpu.memory_space<vmem>>, %arg5: memref<256x128xf32, #tpu.memory_space<vmem>>, %arg6: memref<1x128xf32, #tpu.memory_space<vmem>>, %arg7: memref<8x128xf32, #tpu.memory_space<vmem>>, %arg8: memref<8x128xf32, #tpu.memory_space<vmem>>, %arg9: memref<8x128xf32, #tpu.memory_space<vmem>>) attributes {dimension_semantics = [#tpu.dimension_semantics<parallel>, #tpu.dimension_semantics<arbitrary>], iteration_bounds = array<i64: 2, 2>, scalar_prefetch = 0 : i64, scratch_operands = 2 : i64, tpu.core_type = #tpu.core_type<tc>, window_params = [{transform_indices = @transform_0, window_bounds = array<i64: 8, 128>}, {pipeline_mode = #tpu.pipeline_mode<synchronous>, transform_indices = @transform_1, window_bounds = array<i64: 256, 128>}, {transform_indices = @transform_2, window_bounds = array<i64: 1, 128>}, {pipeline_mode = #tpu.pipeline_mode<synchronous>, transform_indices = @transform_3, window_bounds = array<i64: 256, 128>}, {pipeline_mode = #tpu.pipeline_mode<synchronous>, transform_indices = @transform_4, window_bounds = array<i64: 1, 128>}, {transform_indices = @transform_5, window_bounds = array<i64: 8, 128>}]} {
    %c0_i32 = arith.constant 0 : i32
    %0 = arith.cmpi eq, %arg1, %c0_i32 : i32
    %1 = arith.extui %0 : i1 to i32
    %c0_i32_0 = arith.constant 0 : i32
    %2 = arith.cmpi ne, %1, %c0_i32_0 : i32
    scf.if %2 {
      %c0_16 = arith.constant 0 : index
      %c0_17 = arith.constant 0 : index
      %34 = vector.load %arg2[%c0_16, %c0_17] : memref<8x128xf32, #tpu.memory_space<vmem>>, vector<8x128xf32>
      %cst_18 = arith.constant dense<0.000000e+00> : vector<8xf32>
      %35 = vector.multi_reduction <add>, %34, %cst_18 [1] : vector<8x128xf32> to vector<8xf32>
      %36 = vector.shape_cast %35 : vector<8xf32> to vector<8x1xf32>
      %cst_19 = arith.constant 1.280000e+02 : f32
      %37 = vector.broadcast %cst_19 : f32 to vector<8x1xf32>
      %38 = arith.divf %36, %37 : vector<8x1xf32>
      %39 = vector.broadcast %38 : vector<8x1xf32> to vector<8x128xf32>
      %40 = arith.subf %34, %39 : vector<8x128xf32>
      %41 = arith.mulf %40, %40 : vector<8x128xf32>
      %cst_20 = arith.constant dense<0.000000e+00> : vector<8xf32>
      %42 = vector.multi_reduction <add>, %41, %cst_20 [1] : vector<8x128xf32> to vector<8xf32>
      %43 = vector.shape_cast %42 : vector<8xf32> to vector<8x1xf32>
      %cst_21 = arith.constant 1.280000e+02 : f32
      %44 = vector.broadcast %cst_21 : f32 to vector<8x1xf32>
      %45 = arith.divf %43, %44 : vector<8x1xf32>
      %cst_22 = arith.constant 9.99999997E-7 : f32
      %46 = vector.broadcast %cst_22 : f32 to vector<8x1xf32>
      %47 = arith.addf %45, %46 : vector<8x1xf32>
      %48 = math.rsqrt %47 : vector<8x1xf32>
      %49 = vector.broadcast %48 : vector<8x1xf32> to vector<8x128xf32>
      %50 = arith.mulf %40, %49 : vector<8x128xf32>
      %c0_23 = arith.constant 0 : index
      %c0_24 = arith.constant 0 : index
      %51 = vector.load %arg8[%c0_23, %c0_24] : memref<8x128xf32, #tpu.memory_space<vmem>>, vector<8x128xf32>
      tpu.vector_store %arg8[%c0_23, %c0_24], %50 {strides = array<i32>} : memref<8x128xf32, #tpu.memory_space<vmem>>, vector<8x128xf32>,
      %cst_25 = arith.constant 0.000000e+00 : f32
      %52 = vector.broadcast %cst_25 : f32 to vector<8x128xf32>
      %c0_26 = arith.constant 0 : index
      %c0_27 = arith.constant 0 : index
      %53 = vector.load %arg9[%c0_26, %c0_27] : memref<8x128xf32, #tpu.memory_space<vmem>>, vector<8x128xf32>
      tpu.vector_store %arg9[%c0_26, %c0_27], %52 {strides = array<i32>} : memref<8x128xf32, #tpu.memory_space<vmem>>, vector<8x128xf32>,
    } else {
    }
    %c128_i32 = arith.constant 128 : i32
    %3 = arith.muli %arg1, %c128_i32 : i32
    %4 = tpu.assume_multiple %3, 8 : i32
    %5 = arith.index_cast %4 : i32 to index
    %c0 = arith.constant 0 : index
    %6 = vector.load %arg3[%5, %c0] : memref<256x128xf32, #tpu.memory_space<vmem>>, vector<128x128xf32>
    %7 = arith.index_cast %4 : i32 to index
    %c0_1 = arith.constant 0 : index
    %8 = vector.load %arg5[%7, %c0_1] : memref<256x128xf32, #tpu.memory_space<vmem>>, vector<128x128xf32>
    %c0_2 = arith.constant 0 : index
    %c0_3 = arith.constant 0 : index
    %9 = vector.load %arg8[%c0_2, %c0_3] : memref<8x128xf32, #tpu.memory_space<vmem>>, vector<8x128xf32>
    %cst = arith.constant dense<0.000000e+00> : vector<8x128xf32>
    %10 = tpu.matmul %9, %6, %cst {dimension_numbers = #tpu.dot_dimension_numbers<[1], [1], [0], [0], [0, 0, 1, 0], [], []>} : vector<8x128xf32>, vector<128x128xf32>, vector<8x128xf32> -> vector<8x128xf32>
    %c0_4 = arith.constant 0 : index
    %c0_5 = arith.constant 0 : index
    %11 = vector.load %arg4[%c0_4, %c0_5] : memref<1x128xf32, #tpu.memory_space<vmem>>, vector<1x128xf32>
    %12 = vector.broadcast %11 : vector<1x128xf32> to vector<8x128xf32>
    %13 = arith.addf %10, %12 : vector<8x128xf32>
    %cst_6 = arith.constant 5.000000e-01 : f32
    %14 = vector.broadcast %cst_6 : f32 to vector<8x128xf32>
    %15 = arith.mulf %14, %13 : vector<8x128xf32>
    %cst_7 = arith.constant 4.471500e-02 : f32
    %16 = vector.broadcast %cst_7 : f32 to vector<8x128xf32>
    %17 = arith.mulf %16, %13 : vector<8x128xf32>
    %18 = arith.mulf %17, %13 : vector<8x128xf32>
    %19 = arith.mulf %18, %13 : vector<8x128xf32>
    %20 = arith.addf %13, %19 : vector<8x128xf32>
    %cst_8 = arith.constant 0.797884583 : f32
    %21 = vector.broadcast %cst_8 : f32 to vector<8x128xf32>
    %22 = arith.mulf %21, %20 : vector<8x128xf32>
    %23 = math.tanh %22 : vector<8x128xf32>
    %cst_9 = arith.constant 1.000000e+00 : f32
    %24 = vector.broadcast %cst_9 : f32 to vector<8x128xf32>
    %25 = arith.addf %24, %23 : vector<8x128xf32>
    %26 = arith.mulf %15, %25 : vector<8x128xf32>
    %c0_10 = arith.constant 0 : index
    %c0_11 = arith.constant 0 : index
    %27 = vector.load %arg9[%c0_10, %c0_11] : memref<8x128xf32, #tpu.memory_space<vmem>>, vector<8x128xf32>
    %cst_12 = arith.constant dense<0.000000e+00> : vector<8x128xf32>
    %28 = tpu.matmul %26, %8, %cst_12 {dimension_numbers = #tpu.dot_dimension_numbers<[1], [0], [0], [1], [0, 0, 1, 1], [], []>} : vector<8x128xf32>, vector<128x128xf32>, vector<8x128xf32> -> vector<8x128xf32>
    %29 = arith.addf %27, %28 : vector<8x128xf32>
    %c0_13 = arith.constant 0 : index
    %c0_14 = arith.constant 0 : index
    %30 = vector.load %arg9[%c0_13, %c0_14] : memref<8x128xf32, #tpu.memory_space<vmem>>, vector<8x128xf32>
    tpu.vector_store %arg9[%c0_13, %c0_14], %29 {strides = array<i32>} : memref<8x128xf32, #tpu.memory_space<vmem>>, vector<8x128xf32>,
    %c1_i32 = arith.constant 1 : i32
    %31 = arith.cmpi eq, %arg1, %c1_i32 : i32
    %32 = arith.extui %31 : i1 to i32
    %c0_i32_15 = arith.constant 0 : i32
    %33 = arith.cmpi ne, %32, %c0_i32_15 : i32
    scf.if %33 {
      %c0_16 = arith.constant 0 : index
      %c0_17 = arith.constant 0 : index
      %34 = vector.load %arg9[%c0_16, %c0_17] : memref<8x128xf32, #tpu.memory_space<vmem>>, vector<8x128xf32>
      %c0_18 = arith.constant 0 : index
      %c0_19 = arith.constant 0 : index
      %35 = vector.load %arg6[%c0_18, %c0_19] : memref<1x128xf32, #tpu.memory_space<vmem>>, vector<1x128xf32>
      %36 = vector.broadcast %35 : vector<1x128xf32> to vector<8x128xf32>
      %37 = arith.addf %34, %36 : vector<8x128xf32>
      %c0_20 = arith.constant 0 : index
      %c0_21 = arith.constant 0 : index
      %38 = vector.load %arg2[%c0_20, %c0_21] : memref<8x128xf32, #tpu.memory_space<vmem>>, vector<8x128xf32>
      %39 = arith.addf %37, %38 : vector<8x128xf32>
      %c0_22 = arith.constant 0 : index
      %c0_23 = arith.constant 0 : index
      %40 = vector.load %arg7[%c0_22, %c0_23] : memref<8x128xf32, #tpu.memory_space<vmem>>, vector<8x128xf32>
      tpu.vector_store %arg7[%c0_22, %c0_23], %39 {strides = array<i32>} : memref<8x128xf32, #tpu.memory_space<vmem>>, vector<8x128xf32>,
    } else {
    }
    return
  }
  func.func @transform_0(%arg0: i32, %arg1: i32) -> (i32, i32) {
    %c0_i32 = arith.constant 0 : i32
    %c0_i32_0 = arith.constant 0 : i32
    return %arg0, %c0_i32 : i32, i32
  }
  func.func @transform_1(%arg0: i32, %arg1: i32) -> (i32, i32) {
    %c0_i32 = arith.constant 0 : i32
    %c0_i32_0 = arith.constant 0 : i32
    %c0_i32_1 = arith.constant 0 : i32
    return %c0_i32, %c0_i32_0 : i32, i32
  }
  func.func @transform_2(%arg0: i32, %arg1: i32) -> (i32, i32) {
    %c0_i32 = arith.constant 0 : i32
    %c0_i32_0 = arith.constant 0 : i32
    return %c0_i32, %arg1 : i32, i32
  }
  func.func @transform_3(%arg0: i32, %arg1: i32) -> (i32, i32) {
    %c0_i32 = arith.constant 0 : i32
    %c0_i32_0 = arith.constant 0 : i32
    %c0_i32_1 = arith.constant 0 : i32
    return %c0_i32, %c0_i32_0 : i32, i32
  }
  func.func @transform_4(%arg0: i32, %arg1: i32) -> (i32, i32) {
    %c0_i32 = arith.constant 0 : i32
    %c0_i32_0 = arith.constant 0 : i32
    %c0_i32_1 = arith.constant 0 : i32
    return %c0_i32, %c0_i32_0 : i32, i32
  }
  func.func @transform_5(%arg0: i32, %arg1: i32) -> (i32, i32) {
    %c0_i32 = arith.constant 0 : i32
    %c0_i32_0 = arith.constant 0 : i32
    return %arg0, %c0_i32 : i32, i32
  }
}

</mosaic_0001>

<bundles_post_ra>
// kernel: tpu_custom_call.1
= control target key start
LH: loop header
LB: loop body
LE: loop exit
PB: predicated region body
PF: predicated region fallthrough
CT: control target
= control target key end

     0   :  { %s1404_s0 = inlined_call_operand.hbm [shape: f32[16,128], index: 0, kind: input, shape index: {}]   ;;  %s1405_s1 = inlined_call_operand.hbm [shape: f32[256,128], index: 1, kind: input, shape index: {}]   ;;  %s1406_s2 = inlined_call_operand.vmem [shape: f32[1,256], index: 2, kind: input, shape index: {}]   ;;  %s1407_s3 = inlined_call_operand.hbm [shape: f32[256,128], index: 3, kind: input, shape index: {}]   ;;  %s1408_s4 = inlined_call_operand.vmem [shape: f32[1,128], index: 4, kind: input, shape index: {}]   ;;  %s1409_s5 = inlined_call_operand.hbm [shape: f32[16,128], index: 5, kind: output, shape index: {}]  }
   0x1   :  { %1415 = sst [smem:[#allocation17_spill]] %s1405_s1 }
   0x2   :  { %1416 = sst [smem:[#allocation18_spill]] %s1407_s3 }
   0x3   :  { %10 = vsyncpa [#allocation5], 0 }
   0x4   :  { %12 = vsyncpa [#allocation5 + $0x1], 0 }
   0x5   :  { %13 = vsyncpa [#allocation8], 0 }
   0x6   :  { %14 = vsyncpa [#allocation6], 0 }
   0x7   :  { %16 = vsyncpa [#allocation6 + $0x1], 0  ;;  %s1107_s18 = smov 0   ;;  %s1109_s19 = smov 0  }
   0x8   :  { %s1111_s20 = smov 0   ;;  %s1113_s21 = smov 0  }
   0x9   :  { %s1115_s22 = smov 0   ;;  %s1117_s23 = smov 0  }
   0xa   :  { %s1119_s24 = smov 0   ;;  %s1121_s25 = smov 0  }
   0xb LB: > { %1417 = sst [smem:[#allocation14_spill]] %s1058_s23  ;;  %s652_s26 = sadd.s32 4294967295, %s1066_s25   ;;  %s1066_s25 = sphi %s1121_s25, %s22_s25   ;;  %s1062_s24 = sphi %s1119_s24, %s1441_s24   ;;  %s1058_s23 = sphi %s1117_s23, %s1435_s23   ;;  %s1054_s22 = sphi %s1115_s22, %s1440_s22   ;;  %s1050_s21 = sphi %s1113_s21, %s1434_s21   ;;  %s1046_s20 = sphi %s1111_s20, %s1439_s20   ;;  %s1042_s19 = sphi %s1109_s19, %s1438_s19   ;;  %s1038_s18 = sphi %s1107_s18, %s1437_s18  }
   0xc   : > { %s653_s27 = sadd.s32 4294967294, %s1066_s25   ;;  %p54_p0 = scmp.ne.s32.totalorder %s1042_s19, %s1038_s18 }
   0xd   : > { %p1151_p1 = scmp.eq.s32.totalorder %s652_s26, 0  ;;  %p1155_p2 = scmp.eq.s32.totalorder %s652_s26, 3 }
   0xe   : > { %p173_p3 = scmp.eq.s32.totalorder %s653_s27, 3  ;;  %p654_p5 = scmp.ge.s32.totalorder %s1066_s25, 1 }
   0xf   : > { %s1418_s28 = scalar_select %p1151_p1, 1, 0 }
  0x10   : > { %p1161_p4 = por %p1151_p1, %p54_p0  ;;  %p1166_p6 = por %p173_p3, %p54_p0 }
  0x11   : > { %p180_p7 = scmp.lt.s32.totalorder %s1066_s25, 5  ;;  %s1068_s8 = smov [#allocation7]  }
  0x12   : > { %s1420_s30 = scalar_select %p1161_p4, 1, 0 }
  0x13   : > { %s1421_s6 = scalar_select %p1166_p6, 1, 0 }
  0x14   : > { %p1171_p8 = pnand %p654_p5, %p180_p7  ;;  %s192_s9 = sshll.u32 %s1068_s8, 4  ;;  %s193_s9 = int_to_ptr.vmem [resolvable:$true] %s192_s9 }
  0x15   : > { %s1069_s11 = smov [#allocation9]   ;;  %s897_s13 = scalar_lea.vmem %s193_s9, 4096 }
  0x16   : > { %p790_p9 = pneg %p1171_p8  ;;  %s205_s12 = sshll.u32 %s1069_s11, 4  ;;  %s206_s12 = int_to_ptr.vmem [resolvable:$true] %s205_s12 }
  0x17   : > { %p898_p12 = scmp.ne.s32.totalorder %s193_s9, %s897_s13  ;;  %p905_p3 = scmp.lt.s32.totalorder %s193_s9, %s193_s9 }
  0x18   : > { %p1179_p10 = pnand %p790_p9, %p1151_p1  ;;  %p906_p5 = scmp.lt.s32.totalorder %s897_s13, %s897_s13 }
  0x1a   : > { %p888_p11 = pneg %p1179_p10  ;;  %p907_p7 = por %p906_p5, %p905_p3 }
  0x1c   : > { %p900_p13 = pnand %p898_p12, %p888_p11 }
  0x1e   : > { %p901_p0 = pneg %p900_p13 }
  0x20   : > { %p908_p9 = pnand %p907_p7, %p901_p0 }
  0x22   : > { %911 = shalt.err (!%p908_p9)
}
  0x23   : > { %s1070_s14 = smov 128   ;;  %s1071_s15 = smov 8  }
  0x24   : > { %s1424_s1 = sld [smem:[#allocation17_spill]]  ;;  %s923_s26 = scalar_lea.vmem %s206_s12, 4096 }
  0x25   : > { %p924_p6 = scmp.ne.s32.totalorder %s206_s12, %s923_s26  ;;  %p931_p1 = scmp.lt.s32.totalorder %s206_s12, %s206_s12 }
  0x26   : > { %p932_p4 = scmp.lt.s32.totalorder %s923_s26, %s923_s26 }
  0x27   : > { %p926_p12 = pnand %p924_p6, %p888_p11 }
  0x28   : > { %p933_p3 = por %p932_p4, %p931_p1 }
  0x29   : > { %p927_p13 = pneg %p926_p12 }
  0x2a   : > { %793 = dma.hbm_to_vmem [thread:$0]  (!%p1179_p10), %s1424_s1, 4096, %s193_s9, [#allocation8], %s1070_s14, %s1070_s14, %s1071_s15  }
  0x2b   : > { %p934_p0 = pnand %p933_p3, %p927_p13 }
  0x2d   : > { %937 = shalt.err (!%p934_p0)
}
  0x2e   : > { %s1425_s3 = sld [smem:[#allocation18_spill]]  ;;  %s31_s9 = sadd.s32 1, %s1058_s23 }
  0x2f   : > { %s34_s11 = sadd.s32 1, %s1062_s24  ;;  %p32_p1 = scmp.ge.s32.totalorder %s31_s9, 2 }
  0x30   : > { %s41_s10 = sadd.s32 1, %s1046_s20  ;;  %p48_p4 = scmp.ne.s32.totalorder %s1046_s20, %s1042_s19 }
  0x31   : > { %p49_p6 = scmp.eq.s32.totalorder %s1066_s25, 0  ;;  %s1443_s9 = smov (%p32_p1, %s31_s9), 0 }
  0x32   : > { %1426 = sst [smem:[#allocation15_spill]] %s1443_s9  ;;  %s1445_s11 = smov (!%p32_p1, %s34_s11), %s1062_s24 }
  0x33   : > { %p1210_p11 = por %p49_p6, %p48_p4  ;;  %p1216_p5 = por %p1155_p2, %p48_p4 }
  0x34   : > { %796 = dma.hbm_to_vmem [thread:$0]  (!%p1179_p10), %s1425_s3, 4096, %s206_s12, [#allocation8], %s1070_s14, %s1070_s14, %s1071_s15  }
  0x35   : > { %p36_p10 = scmp.ge.s32.totalorder %s1445_s11, 2  ;;  %p807_p7 = scmp.lt.s32.totalorder %s1066_s25, 4 }
  0x36   : > { %s222_s12 = sand.u32 1, %s1046_s20   ;;  %s659_s14 = sshll.u32 %s1062_s24, 7 }
  0x37   : > { %s1447_s11 = smov (%p36_p10, %s1445_s11), 0  ;;  %s658_s15 = sshll.u32 %s222_s12, 3 }
  0x38   : > { %1429 = sst [smem:[#allocation16_spill]] %s1447_s11  ;;  %s38_s17 = ssub.s32 %s1062_s24, %s1447_s11 }
  0x39   : > { %p39_p9 = scmp.eq.s32.totalorder %s38_s17, 0  ;;  %s231_s8 = scalar_lea.hbm %s1404_s0, %s659_s14 }
  0x3a   : > { %s226_s29 = scalar_lea.vmem [#allocation4], %s658_s15  ;;  %p1232_p2 = pnand %p807_p7, %p1210_p11 }
  0x3b   : > { %s233_s1 = sshll.u32 %s226_s29, 4  ;;  %s223_s23 = scalar_lea.sflag [#allocation5], %s222_s12  ;;  %s234_s1 = int_to_ptr.vmem [resolvable:$true] %s233_s1 }
  0x3c   : > { %s1237_s9 = scalar_select %p39_p9, %s1046_s20, %s41_s10  }
  0x3d   : > { %p940_p12 = pneg %p1232_p2  ;;  %s951_s11 = scalar_lea.vmem %s234_s1, 128 }
  0x3e   : > { %p952_p13 = scmp.ne.s32.totalorder %s234_s1, %s951_s11  ;;  %s1072_s17 = smov [#allocation4]  }
  0x3f   : > { %s956_s14 = sshll.u32 %s1072_s17, 4  ;;  %s957_s14 = int_to_ptr.vmem [resolvable:$false] %s956_s14 }
  0x40   : > { %p954_p3 = pnand %p952_p13, %p940_p12  ;;  %s958_s15 = scalar_lea.vmem %s957_s14, 256 }
  0x41   : > { %p959_p1 = scmp.lt.s32.totalorder %s234_s1, %s957_s14  ;;  %p960_p4 = scmp.lt.s32.totalorder %s958_s15, %s951_s11 }
  0x42   : > { %p955_p0 = pneg %p954_p3 }
  0x43   : > { %p961_p6 = por %p960_p4, %p959_p1 }
  0x45   : > { %p962_p11 = pnand %p961_p6, %p955_p0 }
  0x47   : > { %965 = shalt.err (!%p962_p11)
}
  0x48   : > { %800 = dma.hbm_to_vmem [thread:$0]  (!%p1232_p2), %s231_s8, 128, %s234_s1, %s223_s23  }
  0x49   : > { %248 = sbr.rel (%p1171_p8) target bundleno = 914 (0x392), region = 40  ;;  %s1246_s10 = sand.u32 (!%p1171_p8), 1, %s1042_s19  }
  0x4a   : > { %s661_s13 = sshll.u32 (!%p1171_p8), %s1246_s10, 3  ;;  %s251_s12 = scalar_lea.sflag (!%p1171_p8), [#allocation5], %s1246_s10 }
  0x4b   : > { %s1250_s26 = scalar_lea.vmem (!%p1171_p8), [#allocation4], %s661_s13  ;;  %p1431_p10 = scmp.ne.s32.totalorder (!%p1171_p8), %s1420_s30, 0 }
  0x4e   : > { %1025 = dma.done.wait (%p1431_p10), %s251_s12, 128  }
  0x4f   : > { %1027 = vsyncadd (%p1431_p10), %s251_s12, 4294967168  ;;  %p1432_p7 = scmp.ne.s32.totalorder %s1418_s28, 0 }
  0x51   : > { %1029 = dma.done.wait (%p1432_p7), [#allocation8], 8192  }
  0x52   : > { %1031 = vsyncadd (%p1432_p7), [#allocation8], 4294959104  ;;  %p292_p8 = scmp.lt.s32.totalorder %s1050_s21, 1  ;;  %s1268_s11 = scalar_lea.vmem [#allocation10], %s661_s13 }
  0x53   : > { %p665_p9 = scmp.ne.s32.totalorder %s1050_s21, 0 }
  0x54   : > { %s1262_s1 = scalar_select %p292_p8, %s1050_s21, 1 }
  0x55   : > { %298 = sbr.rel (%p665_p9) target bundleno = 394 (0x18a), region = 56 }
  0x56   : > { %s294_s7 = scalar_lea.vmem %s1406_s2, %s1262_s1 }
  0x5a   : > { %v299_v0 = vld [vmem:[%s1250_s26] sm:$0xff]  ;;  %v1073_v5 = vmov 0.0  }
  0x5b   : > { %300 = vadd.xlane.f32.xlu0 %v299_v0  ;;  %313 = vst [vmem:[#allocation3] sm:$0xff] %v1073_v5 }
  0xe4   : > { %v301_v1 = vpop.xlane.xlu0 %300 }
  0xe5   : > { %v303_v2 = vmul.f32 0.0078125, %v301_v1 }
  0xe7   : > { %v304_v3 = vsub.f32 %v299_v0, %v303_v2 }
  0xe9   : > { %v305_v4 = vmul.f32 %v304_v3, %v304_v3 }
  0xeb   : > { %306 = vadd.xlane.f32.xlu0 %v305_v4 }
 0x174   : > { %v307_v6 = vpop.xlane.xlu0 %306 }
 0x175   : > { %v308_v7 = vmul.f32 0.0078125, %v307_v6 }
 0x177   : > { %v309_v8 = vadd.f32 1e-06, %v308_v7 }
 0x179   : > { %882 = vrsqrt.f32 %v309_v8 }
 0x186   : > { %v883_v9 = vpop.eup %882 }
 0x187   : > { %v311_v10 = vmul.f32 %v883_v9, %v304_v3 }
 0x189   : > { %312 = vst [vmem:[#allocation2] sm:$0xff] %v311_v10 }
 0x18a PF: > { %s666_s28 = sshll.u32 %s1050_s21, 7  ;;  %v1074_v11 = vmov 0.0   ;;  %vm1075_vm0 = vmmov 0   ;;  %v667_v45 = vld [vmem:[%s294_s7] ss:$0 sm:$0xff]  ;;  %v436_v58 = vld [vmem:[#allocation3] sm:$0xff] }
 0x18b   : > { %708 = vmatprep.subr.mxu0 %v1074_v11  ;;  %740 = vmatprep.mubr.msk.f32.mxu0 %vm1075_vm0, %v1074_v11  ;;  %s1277_s30 = scalar_lea.vmem [#allocation7], %s666_s28  ;;  %s1314_s27 = scalar_lea.vmem [#allocation9], %s666_s28 }
 0x18c   : > { %v331_v12 = vld [vmem:[%s1277_s30 + $0x78] sm:$0xff]  ;;  %743 = vmatprep.subr.mxu1 %v1074_v11  ;;  %775 = vmatprep.mubr.msk.f32.mxu1 %vm1075_vm0, %v1074_v11  ;;  %v330_v13 = vld [vmem:[%s1277_s30 + $0x70] sm:$0xff]  ;;  %v329_v14 = vld [vmem:[%s1277_s30 + $0x68] sm:$0xff]  ;;  %p668_p2 = scmp.ne.s32.totalorder %s1050_s21, 1 }
 0x18d   : > { %709 = vmatpush3.xpose.msra.mxu0 %v331_v12  ;;  %v328_v15 = vld [vmem:[%s1277_s30 + $0x60] sm:$0xff]  ;;  %v327_v16 = vld [vmem:[%s1277_s30 + $0x58] sm:$0xff]  ;;  %v326_v17 = vld [vmem:[%s1277_s30 + $0x50] sm:$0xff] }
 0x18e   : > { %710 = vmatprep.subr.mxu0 %v1074_v11  ;;  %v325_v18 = vld [vmem:[%s1277_s30 + $0x48] sm:$0xff]  ;;  %v324_v19 = vld [vmem:[%s1277_s30 + $0x40] sm:$0xff]  ;;  %v323_v20 = vld [vmem:[%s1277_s30 + $0x38] sm:$0xff] }
 0x18f   : > { %v322_v21 = vld [vmem:[%s1277_s30 + $0x30] sm:$0xff]  ;;  %v321_v22 = vld [vmem:[%s1277_s30 + $0x28] sm:$0xff]  ;;  %v320_v23 = vld [vmem:[%s1277_s30 + $0x20] sm:$0xff] }
 0x190   : > { %v319_v24 = vld [vmem:[%s1277_s30 + $0x18] sm:$0xff]  ;;  %v318_v25 = vld [vmem:[%s1277_s30 + $0x10] sm:$0xff]  ;;  %v317_v26 = vld [vmem:[%s1277_s30 + $0x8] sm:$0xff] }
 0x191   : > { %711 = vmatpush3.xpose.msra.mxu0 %v330_v13  ;;  %v316_v27 = vld [vmem:[%s1277_s30] sm:$0xff]  ;;  %v348_v29 = vld [vmem:[%s1314_s27 + $0x78] sm:$0xff]  ;;  %v347_v30 = vld [vmem:[%s1314_s27 + $0x70] sm:$0xff] }
 0x192   : > { %712 = vmatprep.subr.mxu0 %v1074_v11  ;;  %v349_v28 = vld [vmem:[#allocation2] sm:$0xff]  ;;  %744 = vmatpush3.msra.mxu1 %v348_v29  ;;  %v346_v31 = vld [vmem:[%s1314_s27 + $0x68] sm:$0xff]  ;;  %v344_v33 = vld [vmem:[%s1314_s27 + $0x58] sm:$0xff] }
 0x193   : > { %745 = vmatprep.subr.mxu1 %v1074_v11  ;;  %v345_v32 = vld [vmem:[%s1314_s27 + $0x60] sm:$0xff]  ;;  %v343_v34 = vld [vmem:[%s1314_s27 + $0x50] sm:$0xff]  ;;  %v342_v35 = vld [vmem:[%s1314_s27 + $0x48] sm:$0xff] }
 0x194   : > { %746 = vmatpush3.msra.mxu1 %v347_v30  ;;  %v341_v36 = vld [vmem:[%s1314_s27 + $0x40] sm:$0xff]  ;;  %v340_v37 = vld [vmem:[%s1314_s27 + $0x38] sm:$0xff]  ;;  %v339_v38 = vld [vmem:[%s1314_s27 + $0x30] sm:$0xff] }
 0x195   : > { %713 = vmatpush3.xpose.msra.mxu0 %v329_v14  ;;  %747 = vmatprep.subr.mxu1 %v1074_v11  ;;  %v338_v39 = vld [vmem:[%s1314_s27 + $0x28] sm:$0xff]  ;;  %v337_v40 = vld [vmem:[%s1314_s27 + $0x20] sm:$0xff]  ;;  %v336_v41 = vld [vmem:[%s1314_s27 + $0x18] sm:$0xff] }
 0x196   : > { %714 = vmatprep.subr.mxu0 %v1074_v11  ;;  %748 = vmatpush3.msra.mxu1 %v346_v31  ;;  %v335_v42 = vld [vmem:[%s1314_s27 + $0x10] sm:$0xff]  ;;  %v334_v43 = vld [vmem:[%s1314_s27 + $0x8] sm:$0xff]  ;;  %v333_v44 = vld [vmem:[%s1314_s27] sm:$0xff] }
 0x197   : > { %749 = vmatprep.subr.mxu1 %v1074_v11 }
 0x198   : > { %750 = vmatpush3.msra.mxu1 %v345_v32 }
 0x199   : > { %715 = vmatpush3.xpose.msra.mxu0 %v328_v15  ;;  %751 = vmatprep.subr.mxu1 %v1074_v11 }
 0x19a   : > { %716 = vmatprep.subr.mxu0 %v1074_v11  ;;  %752 = vmatpush3.msra.mxu1 %v344_v33 }
 0x19b   : > { %753 = vmatprep.subr.mxu1 %v1074_v11 }
 0x19c   : > { %754 = vmatpush3.msra.mxu1 %v343_v34 }
 0x19d   : > { %717 = vmatpush3.xpose.msra.mxu0 %v327_v16  ;;  %755 = vmatprep.subr.mxu1 %v1074_v11 }
 0x19e   : > { %718 = vmatprep.subr.mxu0 %v1074_v11  ;;  %756 = vmatpush3.msra.mxu1 %v342_v35 }
 0x19f   : > { %757 = vmatprep.subr.mxu1 %v1074_v11 }
 0x1a0   : > { %758 = vmatpush3.msra.mxu1 %v341_v36 }
 0x1a1   : > { %719 = vmatpush3.xpose.msra.mxu0 %v326_v17  ;;  %759 = vmatprep.subr.mxu1 %v1074_v11 }
 0x1a2   : > { %720 = vmatprep.subr.mxu0 %v1074_v11  ;;  %760 = vmatpush3.msra.mxu1 %v340_v37 }
 0x1a3   : > { %761 = vmatprep.subr.mxu1 %v1074_v11 }
 0x1a4   : > { %762 = vmatpush3.msra.mxu1 %v339_v38 }
 0x1a5   : > { %721 = vmatpush3.xpose.msra.mxu0 %v325_v18  ;;  %763 = vmatprep.subr.mxu1 %v1074_v11 }
 0x1a6   : > { %722 = vmatprep.subr.mxu0 %v1074_v11  ;;  %764 = vmatpush3.msra.mxu1 %v338_v39 }
 0x1a7   : > { %765 = vmatprep.subr.mxu1 %v1074_v11 }
 0x1a8   : > { %766 = vmatpush3.msra.mxu1 %v337_v40 }
 0x1a9   : > { %723 = vmatpush3.xpose.msra.mxu0 %v324_v19  ;;  %767 = vmatprep.subr.mxu1 %v1074_v11 }
 0x1aa   : > { %724 = vmatprep.subr.mxu0 %v1074_v11  ;;  %768 = vmatpush3.msra.mxu1 %v336_v41 }
 0x1ab   : > { %769 = vmatprep.subr.mxu1 %v1074_v11 }
 0x1ac   : > { %770 = vmatpush3.msra.mxu1 %v335_v42 }
 0x1ad   : > { %725 = vmatpush3.xpose.msra.mxu0 %v323_v20  ;;  %771 = vmatprep.subr.mxu1 %v1074_v11 }
 0x1ae   : > { %726 = vmatprep.subr.mxu0 %v1074_v11  ;;  %772 = vmatpush3.msra.mxu1 %v334_v43 }
 0x1af   : > { %773 = vmatprep.subr.mxu1 %v1074_v11 }
 0x1b0   : > { %774 = vmatpush3.msra.mxu1 %v333_v44 }
 0x1b1   : > { %727 = vmatpush3.xpose.msra.mxu0 %v322_v21 }
 0x1b2   : > { %728 = vmatprep.subr.mxu0 %v1074_v11 }
 0x1b5   : > { %729 = vmatpush3.xpose.msra.mxu0 %v321_v22 }
 0x1b6   : > { %730 = vmatprep.subr.mxu0 %v1074_v11 }
 0x1b9   : > { %731 = vmatpush3.xpose.msra.mxu0 %v320_v23 }
 0x1ba   : > { %732 = vmatprep.subr.mxu0 %v1074_v11 }
 0x1bd   : > { %733 = vmatpush3.xpose.msra.mxu0 %v319_v24 }
 0x1be   : > { %734 = vmatprep.subr.mxu0 %v1074_v11 }
 0x1c1   : > { %735 = vmatpush3.xpose.msra.mxu0 %v318_v25 }
 0x1c2   : > { %736 = vmatprep.subr.mxu0 %v1074_v11 }
 0x1c5   : > { %737 = vmatpush3.xpose.msra.mxu0 %v317_v26 }
 0x1c6   : > { %738 = vmatprep.subr.mxu0 %v1074_v11 }
 0x1c9   : > { %739 = vmatpush3.xpose.msra.mxu0 %v316_v27 }
 0x1cc   : > { %741 = vmatmul.mubr.f32.vlgmr.msra.gmra.mxu0 %v349_v28 }
 0x28c   : > { %v423_v46 = vpop.f32.mrf.mxu0 }
 0x28d   : > { %v424_v47 = vadd.f32 %v667_v45, %v423_v46 }
 0x28e   : > { %v742_v48 = vpop.f32.mrf.mxu0 }
 0x28f   : > { %v428_v49 = vmul.f32 0.044715, %v424_v47  ;;  %v427_v55 = vmul.f32 0.5, %v424_v47 }
 0x291   : > { %v429_v50 = vmul.f32 %v428_v49, %v424_v47 }
 0x293   : > { %v430_v51 = vmul.f32 %v429_v50, %v424_v47 }
 0x295   : > { %v431_v52 = vadd.f32 %v430_v51, %v424_v47 }
 0x297   : > { %v432_v53 = vmul.f32 0.7978846, %v431_v52 }
 0x299   : > { %884 = vtanh.f32 %v432_v53 }
 0x2a6   : > { %v885_v54 = vpop.eup %884 }
 0x2a7   : > { %v434_v56 = vadd.f32 1.0, %v885_v54 }
 0x2a9   : > { %v435_v57 = vmul.f32 %v434_v56, %v427_v55 }
 0x2ab   : > { %776 = vmatmul.mubr.f32.vlgmr.msra.gmra.mxu1 %v435_v57 }
 0x36a   : > { %512 = sbr.rel (%p668_p2) target bundleno = 891 (0x37b), region = 60 }
 0x36b   : > { %v503_v59 = vpop.f32.mrf.mxu1 }
 0x36c   : > { %v507_v60 = vadd.f32 %v503_v59, %v436_v58 }
 0x36d   : > { %v777_v61 = vpop.f32.mrf.mxu1 }
 0x36e   : > { %508 = vst [vmem:[#allocation3] sm:$0xff] %v507_v60 }
 0x36f   : > { %v669_v63 = vld [vmem:[%s1408_s4] ss:$0 sm:$0xff]  ;;  %v522_v0 = vld [vmem:[%s1250_s26] sm:$0xff] }
 0x375   : > { %v513_v62 = vld [vmem:[#allocation3] sm:$0xff] }
 0x376   : > { %v521_v1 = vadd.f32 %v669_v63, %v513_v62 }
 0x378   : > { %v523_v2 = vadd.f32 %v522_v0, %v521_v1 }
 0x37a   : > { %524 = vst [vmem:[%s1268_s11] sm:$0xff] %v523_v2 }
 0x37b PF: > { %s671_s15 = sshll.u32 %s1054_s22, 7  ;;  %s539_s1 = sshll.u32 %s1268_s11, 4  ;;  %s540_s1 = int_to_ptr.vmem [resolvable:$true] %s539_s1 }
 0x37c   : > { %s537_s12 = scalar_lea.hbm %s1409_s5, %s671_s15  ;;  %s526_s3 = scalar_lea.sflag [#allocation6], %s1246_s10 }
 0x37d   : > { %s966_s23 = scalar_lea.vmem %s540_s1, 128  ;;  %s1076_s26 = smov [#allocation10]  }
 0x37e   : > { %p967_p12 = scmp.ne.s32.totalorder %s540_s1, %s966_s23  ;;  %s970_s7 = sshll.u32 %s1076_s26, 4  ;;  %s971_s7 = int_to_ptr.vmem [resolvable:$false] %s970_s7 }
 0x37f   : > { %s972_s28 = scalar_lea.vmem %s971_s7, 256  ;;  %p973_p0 = scmp.lt.s32.totalorder %s540_s1, %s971_s7 }
 0x380   : > { %p968_p13 = pnand %p967_p12, %p1216_p5  ;;  %p974_p1 = scmp.lt.s32.totalorder %s972_s28, %s966_s23 }
 0x382   : > { %p969_p3 = pneg %p968_p13  ;;  %p975_p4 = por %p974_p1, %p973_p0 }
 0x384   : > { %p976_p6 = pnand %p975_p4, %p969_p3 }
 0x386   : > { %979 = shalt.err (!%p976_p6)
}
 0x387   : > { %s980_s22 = scalar_lea.hbm %s537_s12, 128  ;;  %s984_s30 = scalar_lea.hbm %s1409_s5, 256 }
 0x388   : > { %p981_p11 = scmp.ne.s32.totalorder %s537_s12, %s980_s22  ;;  %p985_p8 = scmp.lt.s32.totalorder %s537_s12, %s1409_s5 }
 0x389   : > { %p986_p9 = scmp.lt.s32.totalorder %s984_s30, %s980_s22 }
 0x38a   : > { %p982_p10 = pnand %p981_p11, %p1216_p5 }
 0x38b   : > { %p987_p2 = por %p986_p9, %p985_p8 }
 0x38c   : > { %p983_p7 = pneg %p982_p10 }
 0x38e   : > { %p988_p12 = pnand %p987_p2, %p983_p7 }
 0x390   : > { %991 = shalt.err (!%p988_p12)
}
 0x391   : > { %788 = dma.vmem_to_hbm [thread:$0]  (%p1216_p5), %s540_s1, 128, %s537_s12, %s526_s3  }
 0x392 PF: > { %p810_p13 = scmp.ge.s32.totalorder %s1066_s25, 2  ;;  %s551_s29 = sand.u32 1, %s1038_s18  }
 0x393   : > { %p1433_p3 = scmp.ne.s32.totalorder %s1421_s6, 0  ;;  %s552_s17 = scalar_lea.sflag [#allocation6], %s551_s29 }
 0x395   : > { %p802_p0 = pnand %p810_p13, %p1433_p3 }
 0x397   : > { %p803_p1 = pneg %p802_p0 }
 0x399   : > { %1033 = dma.done.wait (%p803_p1), %s552_s17, 128  }
 0x39a   : > { %1035 = vsyncadd (%p803_p1), %s552_s17, 4294967168  ;;  %s22_s25 = sadd.s32 1, %s1066_s25   ;;  %s1434_s21 = sld [smem:[#allocation14_spill]] }
 0x39b   : > { %p19_p4 = scmp.ge.s32.totalorder %s22_s25, 6   ;;  %s1435_s23 = sld [smem:[#allocation15_spill]] }
 0x39c   : > { %s1436_s16 = sld [smem:[#allocation16_spill]]  ;;  %s1437_s18 = smov %s1042_s19 }
 0x39d   : > { %s1438_s19 = smov %s1046_s20  ;;  %s1439_s20 = smov %s1237_s9 }
 0x39e   : > { %s1440_s22 = smov %s1062_s24  ;;  %21 = sbr.rel (!%p19_p4) target bundleno = 11 (0xb), region = 106 }
 0x3a2   : > { %s1441_s24 = smov %s1436_s16 }
 0x3a3   :  { %557 = vsyncpa [#allocation5], 1 }
 0x3a4   :  { %559 = vsyncpa [#allocation5 + $0x1], 1 }
 0x3a5   :  { %560 = vsyncpa [#allocation8], 1 }
 0x3a6   :  { %561 = vsyncpa [#allocation6], 1 }
 0x3a7   :  { %563 = vsyncpa [#allocation6 + $0x1], 1 }

</bundles_post_ra>
